<compile_context>
chip_gen: v7x
topology: tpu7x:2x2x1
jax: 0.10.0
libtpu: 0.0.40
codegen_flags: <defaults>
</compile_context>

<pallas_src>
import jax
import jax.numpy as jnp
from jax.experimental import pallas as pl
from jax.experimental.pallas import tpu as pltpu


_SQRT_HALF = 0.7071067811865476  # 1/sqrt(2)
_LANES_FALLBACK = 512            # used only when no multiple of 128 divides size
_MAX_LANES = 4096


def _gelu_exact(x):
    # nn.GELU() default = exact erf formulation
    return 0.5 * x * (1.0 + jax.lax.erf(x * _SQRT_HALF))


def _two_gelu_math(xf):
    y = _gelu_exact(xf) + 0.2
    return _gelu_exact(y) + 1.5


def two_mygelu_kernel(x_ref, o_ref):
    xf = x_ref[...].astype(jnp.float32)
    o_ref[...] = _two_gelu_math(xf).astype(o_ref.dtype)


def _pick_lanes(total):
    """Largest multiple of 128 (<= _MAX_LANES) that exactly divides `total`."""
    for lanes in range(_MAX_LANES, 127, -128):
        if total % lanes == 0:
            return lanes
    return None


def _vmem_policy():
    """(target_tile_bytes, vmem_limit_bytes) per TPU generation."""
    try:
        kind = jax.devices()[0].device_kind.lower()
    except Exception:  # pragma: no cover - defensive
        kind = ""
    big_vmem = any(g in kind for g in ("v4", "v5", "v6"))  # 128 MiB VMEM parts
    if big_vmem:
        return 8 << 20, 64 << 20
    # v7x (64 MiB physical VMEM) / unknown: stay conservative.
    return 4 << 20, 32 << 20


def _choose_block_rows(rows, lanes, itemsize, target_bytes):
    """Sublane block size: big tiles, packed-sublane-aligned, >=4 grid steps
    when the slab is big enough (balances v7x's two TensorCores)."""
    # Packed sublane multiple: 8 for f32, 16 for bf16, 32 for int8/fp8.
    sub = max(8, 8 * (4 // max(1, itemsize)))
    if rows <= sub:
        return rows  # full-extent block; no (8,128) divisibility needed
    row_bytes = lanes * itemsize
    n_from_tile = pl.cdiv(rows * row_bytes, target_bytes)
    n_steps = max(4, n_from_tile) if rows >= 4 * sub else max(1, n_from_tile)
    block_rows = pl.cdiv(rows, n_steps)
    block_rows = ((block_rows + sub - 1) // sub) * sub
    if block_rows >= rows:
        return rows
    return max(sub, block_rows)


def two_mygelu(x):
    """x: (N, C, H, W) array. Returns same shape/dtype."""
    orig_shape = x.shape
    orig_dtype = x.dtype
    total = int(x.size)
    if total == 0:
        return x
    itemsize = jnp.dtype(orig_dtype).itemsize
    flat = x.reshape(-1)

    lanes = _pick_lanes(total)
    if lanes is not None:
        bulk = total                      # exact factorization, zero padding
    else:
        lanes = _LANES_FALLBACK
        bulk = (total // lanes) * lanes   # tiny (<512-elem) tail handled below

    pieces = []
    if bulk > 0:
        rows = bulk // lanes
        bulk_flat = flat if bulk == total else flat[:bulk]
        x2d = bulk_flat.reshape(rows, lanes)

        target_tile, vmem_limit = _vmem_policy()
        block_rows = _choose_block_rows(rows, lanes, itemsize, target_tile)
        grid = (pl.cdiv(rows, block_rows),)

        out2d = pl.pallas_call(
            two_mygelu_kernel,
            out_shape=jax.ShapeDtypeStruct((rows, lanes), orig_dtype),
            grid_spec=pltpu.PrefetchScalarGridSpec(
                num_scalar_prefetch=0,
                grid=grid,
                in_specs=[pl.BlockSpec((block_rows, lanes), lambda i: (i, 0))],
                out_specs=pl.BlockSpec((block_rows, lanes), lambda i: (i, 0)),
            ),
            compiler_params=pltpu.CompilerParams(
                dimension_semantics=("parallel",),
                vmem_limit_bytes=int(vmem_limit),
            ),
        )(x2d)
        pieces.append(out2d.reshape(-1))

    tail = total - bulk
    if tail > 0:
        # Fewer than `lanes` elements: negligible work, same exact math.
        tail_f32 = flat[bulk:].astype(jnp.float32)
        pieces.append(_two_gelu_math(tail_f32).astype(orig_dtype))

    out_flat = pieces[0] if len(pieces) == 1 else jnp.concatenate(pieces)
    return out_flat.reshape(orig_shape)


def two_mygelu_ref(x):
    return _two_gelu_math(x.astype(jnp.float32)).astype(x.dtype)


if __name__ == "__main__":
    key = jax.random.PRNGKey(0)

    # Primary test: shape implied by the module (NCHW image batch).
    x = jax.random.normal(key, (2, 4, 16, 16), dtype=jnp.float32)
    out = jax.block_until_ready(two_mygelu(x))
    ref = two_mygelu_ref(x)
    assert out.shape == x.shape and out.dtype == x.dtype
    assert jnp.allclose(out, ref, atol=1e-5, rtol=1e-5)

    # Extra check: element count not a multiple of 128 exercises the tail path.
    x2 = jax.random.normal(jax.random.PRNGKey(1), (2, 8, 14, 14), dtype=jnp.float32)
    out2 = jax.block_until_ready(two_mygelu(x2))
    ref2 = two_mygelu_ref(x2)
    assert out2.shape == x2.shape and out2.dtype == x2.dtype
    assert jnp.allclose(out2, ref2, atol=1e-5, rtol=1e-5)

    print("KERNEL_OK")
</pallas_src>

<mosaic_0001>
module attributes {stable_mosaic.version = 11 : i64} {
  func.func @two_mygelu_kernel(%arg0: i32, %arg1: memref<1x2048xf32, #tpu.memory_space<vmem>>, %arg2: memref<1x2048xf32, #tpu.memory_space<vmem>>) attributes {dimension_semantics = [#tpu.dimension_semantics<parallel>], iteration_bounds = array<i64: 1>, scalar_prefetch = 0 : i64, scratch_operands = 0 : i64, tpu.core_type = #tpu.core_type<tc>, window_params = [{transform_indices = @transform_0, window_bounds = array<i64: 1, 2048>}, {transform_indices = @transform_1, window_bounds = array<i64: 1, 2048>}]} {
    %c0 = arith.constant 0 : index
    %c0_0 = arith.constant 0 : index
    %0 = vector.load %arg1[%c0, %c0_0] : memref<1x2048xf32, #tpu.memory_space<vmem>>, vector<1x2048xf32>
    %cst = arith.constant 5.000000e-01 : f32
    %1 = vector.broadcast %cst : f32 to vector<1x2048xf32>
    %2 = arith.mulf %1, %0 : vector<1x2048xf32>
    %cst_1 = arith.constant 0.707106769 : f32
    %3 = vector.broadcast %cst_1 : f32 to vector<1x2048xf32>
    %4 = arith.mulf %0, %3 : vector<1x2048xf32>
    %5 = math.erf %4 : vector<1x2048xf32>
    %cst_2 = arith.constant 1.000000e+00 : f32
    %6 = vector.broadcast %cst_2 : f32 to vector<1x2048xf32>
    %7 = arith.addf %6, %5 : vector<1x2048xf32>
    %8 = arith.mulf %2, %7 : vector<1x2048xf32>
    %cst_3 = arith.constant 2.000000e-01 : f32
    %9 = vector.broadcast %cst_3 : f32 to vector<1x2048xf32>
    %10 = arith.addf %8, %9 : vector<1x2048xf32>
    %cst_4 = arith.constant 5.000000e-01 : f32
    %11 = vector.broadcast %cst_4 : f32 to vector<1x2048xf32>
    %12 = arith.mulf %11, %10 : vector<1x2048xf32>
    %cst_5 = arith.constant 0.707106769 : f32
    %13 = vector.broadcast %cst_5 : f32 to vector<1x2048xf32>
    %14 = arith.mulf %10, %13 : vector<1x2048xf32>
    %15 = math.erf %14 : vector<1x2048xf32>
    %cst_6 = arith.constant 1.000000e+00 : f32
    %16 = vector.broadcast %cst_6 : f32 to vector<1x2048xf32>
    %17 = arith.addf %16, %15 : vector<1x2048xf32>
    %18 = arith.mulf %12, %17 : vector<1x2048xf32>
    %cst_7 = arith.constant 1.500000e+00 : f32
    %19 = vector.broadcast %cst_7 : f32 to vector<1x2048xf32>
    %20 = arith.addf %18, %19 : vector<1x2048xf32>
    %c0_8 = arith.constant 0 : index
    %c0_9 = arith.constant 0 : index
    %21 = vector.load %arg2[%c0_8, %c0_9] : memref<1x2048xf32, #tpu.memory_space<vmem>>, vector<1x2048xf32>
    tpu.vector_store %arg2[%c0_8, %c0_9], %20 {strides = array<i32>} : memref<1x2048xf32, #tpu.memory_space<vmem>>, vector<1x2048xf32>,
    return
  }
  func.func @transform_0(%arg0: i32) -> (i32, i32) {
    %c0_i32 = arith.constant 0 : i32
    %c0_i32_0 = arith.constant 0 : i32
    return %arg0, %c0_i32 : i32, i32
  }
  func.func @transform_1(%arg0: i32) -> (i32, i32) {
    %c0_i32 = arith.constant 0 : i32
    %c0_i32_0 = arith.constant 0 : i32
    return %arg0, %c0_i32 : i32, i32
  }
}

</mosaic_0001>

<bundles_post_ra>
// kernel: tpu_custom_call.1
= control target key start
LH: loop header
LB: loop body
LE: loop exit
PB: predicated region body
PF: predicated region fallthrough
CT: control target
= control target key end

     0   :  { %6 = vsyncpa [#allocation3], 0  ;;  %s158_s0 = inlined_call_operand.hbm [shape: f32[1,2048], index: 0, kind: input, shape index: {}]   ;;  %s159_s1 = inlined_call_operand.hbm [shape: f32[1,2048], index: 1, kind: output, shape index: {}]  }
   0x1   :  { %7 = vsyncpa [#allocation4], 0  ;;  %s122_s6 = smov [#allocation2]   ;;  %s74_s10 = scalar_lea.hbm %s158_s0, 256 }
   0x2   :  { %s14_s7 = sshll.u32 %s122_s6, 4  ;;  %p75_p0 = scmp.ne.s32.totalorder %s158_s0, %s74_s10  ;;  %s15_s7 = int_to_ptr.vmem [resolvable:$true] %s14_s7 }
   0x3   :  { %p78_p1 = scmp.lt.u32.totalorder %s74_s10, %s158_s0 }
   0x5   :  { %p80_p2 = pnand %p78_p1, %p75_p0 }
   0x7   :  { %83 = shalt.err (!%p80_p2)
}
   0x8   :  { %s84_s15 = scalar_lea.vmem %s15_s7, 256  ;;  %p89_p4 = scmp.lt.s32.totalorder %s15_s7, %s15_s7 }
   0x9   :  { %p85_p3 = scmp.ne.s32.totalorder %s15_s7, %s84_s15  ;;  %p90_p5 = scmp.lt.s32.totalorder %s84_s15, %s84_s15 }
   0xb   :  { %p91_p6 = por %p90_p5, %p89_p4 }
   0xd   :  { %p92_p7 = pnand %p91_p6, %p85_p3 }
   0xf   :  { %95 = shalt.err (!%p92_p7)
}
  0x10   :  { %17 = dma.hbm_to_vmem [thread:$0]  %s158_s0, 256, %s15_s7, [#allocation3]  }
  0x11   :  { %118 = dma.done.wait [#allocation3], 256  }
  0x12   :  { %119 = vsyncadd [#allocation3], 4294967040  ;;  %v21_v0 = vld [vmem:[#allocation2] sm:$0xff]  ;;  %v22_v1 = vld [vmem:[#allocation2 + $0x8] sm:$0xff]  ;;  %s123_s0 = smov [#allocation5]  }
  0x13   :  { %v25_v2 = vmul.f32 0.70710677, %v21_v0  ;;  %v26_v3 = vmul.f32 0.70710677, %v22_v1  ;;  %v23_v4 = vmul.f32 0.5, %v21_v0  ;;  %v24_v6 = vmul.f32 0.5, %v22_v1 }
  0x14   :  { %s55_s18 = sshll.u32 %s123_s0, 4  ;;  %s56_s18 = int_to_ptr.vmem [resolvable:$true] %s55_s18 }
  0x15   :  { %66 = verf.f32 %v25_v2  ;;  %s96_s19 = scalar_lea.vmem %s56_s18, 256  ;;  %p101_p9 = scmp.lt.s32.totalorder %s56_s18, %s56_s18 }
  0x16   :  { %68 = verf.f32 %v26_v3  ;;  %p97_p8 = scmp.ne.s32.totalorder %s56_s18, %s96_s19  ;;  %p102_p10 = scmp.lt.s32.totalorder %s96_s19, %s96_s19 }
  0x18   :  { %p103_p11 = por %p102_p10, %p101_p9 }
  0x1a   :  { %p104_p12 = pnand %p103_p11, %p97_p8 }
  0x1f   :  { %v67_v5 = vpop.eup %66 }
  0x20   :  { %v69_v7 = vpop.eup %68  ;;  %v29_v8 = vadd.f32 1.0, %v67_v5 }
  0x21   :  { %v30_v9 = vadd.f32 1.0, %v69_v7 }
  0x22   :  { %v31_v10 = vmul.f32 %v29_v8, %v23_v4 }
  0x23   :  { %v32_v11 = vmul.f32 %v30_v9, %v24_v6 }
  0x24   :  { %v33_v12 = vadd.f32 0.2, %v31_v10 }
  0x25   :  { %v34_v13 = vadd.f32 0.2, %v32_v11 }
  0x26   :  { %v37_v14 = vmul.f32 0.70710677, %v33_v12  ;;  %v35_v16 = vmul.f32 0.5, %v33_v12 }
  0x27   :  { %v38_v15 = vmul.f32 0.70710677, %v34_v13  ;;  %v36_v18 = vmul.f32 0.5, %v34_v13 }
  0x28   :  { %70 = verf.f32 %v37_v14 }
  0x29   :  { %72 = verf.f32 %v38_v15 }
  0x32   :  { %v71_v17 = vpop.eup %70 }
  0x33   :  { %v73_v19 = vpop.eup %72  ;;  %v41_v20 = vadd.f32 1.0, %v71_v17 }
  0x34   :  { %v42_v21 = vadd.f32 1.0, %v73_v19 }
  0x35   :  { %v43_v22 = vmul.f32 %v41_v20, %v35_v16 }
  0x36   :  { %v44_v23 = vmul.f32 %v42_v21, %v36_v18 }
  0x37   :  { %v45_v24 = vadd.f32 1.5, %v43_v22 }
  0x38   :  { %v46_v25 = vadd.f32 1.5, %v44_v23 }
  0x39   :  { %47 = vst [vmem:[#allocation5] sm:$0xff] %v45_v24 }
  0x3a   :  { %48 = vst [vmem:[#allocation5 + $0x8] sm:$0xff] %v46_v25 }
  0x3b   :  { %107 = shalt.err (!%p104_p12)
}
  0x3c   :  { %s108_s22 = scalar_lea.hbm %s159_s1, 256 }
  0x3d   :  { %p109_p13 = scmp.ne.s32.totalorder %s159_s1, %s108_s22  ;;  %p112_p0 = scmp.lt.u32.totalorder %s108_s22, %s159_s1 }
  0x3f   :  { %p114_p1 = pnand %p112_p0, %p109_p13 }
  0x41   :  { %117 = shalt.err (!%p114_p1)
}
  0x42   :  { %58 = dma.vmem_to_hbm [thread:$0]  %s56_s18, 256, %s159_s1, [#allocation4]  }
  0x43   :  { %120 = dma.done.wait [#allocation4], 256  }
  0x44   :  { %121 = vsyncadd [#allocation4], 4294967040 }
  0x45   :  { %62 = vsyncpa [#allocation3], 1 }
  0x46   :  { %63 = vsyncpa [#allocation4], 1 }

</bundles_post_ra>
